<compile_context>
chip_gen: v6e
topology: v6e:2x2x1
jax: 0.10.0
libtpu: 0.0.40
codegen_flags: <defaults>
</compile_context>

<pallas_src>
import functools
import math

import jax
import jax.numpy as jnp
from jax import lax
from jax.experimental import pallas as pl
from jax.experimental.pallas import tpu as pltpu


# ----------------------------------------------------------------------------
# tiling helpers
# ----------------------------------------------------------------------------
def _pick_tile(dim, candidates, multiple):
    """Largest candidate that divides `dim` and is a multiple of `multiple`.
    Falls back to the full dim (always a legal TPU block shape)."""
    for c in candidates:
        if c <= dim and dim % c == 0 and c % multiple == 0:
            return c
    return dim


def _pick_tile_n(N):
    """Output-feature tile: full-N whenever it fits comfortably (<= 1024
    lanes) so the activation tile is read from HBM exactly once and the
    LayerNorm epilogue can be fused; otherwise a 128-multiple divisor."""
    if N <= 1024:
        return N
    for c in (768, 512, 384, 256, 128):
        if N % c == 0:
            return c
    return N


# ----------------------------------------------------------------------------
# Pallas kernels
# ----------------------------------------------------------------------------
def matmul_kernel(x_ref, w_ref, b_ref, o_ref, acc_ref, *, activation):
    """Tiled GEMM with f32 accumulator; bias (+GELU) epilogue on last k step."""
    k = pl.program_id(2)

    @pl.when(k == 0)
    def _():
        acc_ref[...] = jnp.zeros_like(acc_ref)

    acc_ref[...] += jnp.dot(x_ref[...], w_ref[...],
                            preferred_element_type=jnp.float32)

    @pl.when(k == pl.num_programs(2) - 1)
    def _():
        y = acc_ref[...] + b_ref[...].astype(jnp.float32)
        if activation == "gelu":
            # exact (erf-based) GELU, as used by BERT
            y = 0.5 * y * (1.0 + lax.erf(y * (1.0 / math.sqrt(2.0))))
        o_ref[...] = y.astype(o_ref.dtype)


def matmul_add_ln_kernel(x_ref, w_ref, b_ref, r_ref, g_ref, be_ref, o_ref,
                         acc_ref, *, eps):
    """GEMM with bias + residual-add + LayerNorm fused into the epilogue.
    Requires the output block to span the full feature dim (tn == N)."""
    k = pl.program_id(1)

    @pl.when(k == 0)
    def _():
        acc_ref[...] = jnp.zeros_like(acc_ref)

    acc_ref[...] += jnp.dot(x_ref[...], w_ref[...],
                            preferred_element_type=jnp.float32)

    @pl.when(k == pl.num_programs(1) - 1)
    def _():
        y = (acc_ref[...] + b_ref[...].astype(jnp.float32)
             + r_ref[...].astype(jnp.float32))
        mean = jnp.mean(y, axis=-1, keepdims=True)
        yc = y - mean
        var = jnp.mean(yc * yc, axis=-1, keepdims=True)
        norm = yc * lax.rsqrt(var + eps)
        o_ref[...] = (norm * g_ref[...].astype(jnp.float32)
                      + be_ref[...].astype(jnp.float32)).astype(o_ref.dtype)


def layernorm_kernel(x_ref, g_ref, b_ref, o_ref, *, eps):
    x = x_ref[...].astype(jnp.float32)
    mean = jnp.mean(x, axis=-1, keepdims=True)
    xc = x - mean
    var = jnp.mean(xc * xc, axis=-1, keepdims=True)
    norm = xc * lax.rsqrt(var + eps)
    o_ref[...] = (norm * g_ref[...].astype(jnp.float32)
                  + b_ref[...].astype(jnp.float32)).astype(o_ref.dtype)


def attn_kernel(qkv_ref, m_ref, o_ref, acc_ref, *, n_heads, d_model):
    """Per-batch multi-head attention over the fused QKV projection.

    qkv_ref: (1, S, 3D) bf16; m_ref: (1, 1, S) additive mask bias (f32);
    o_ref: (1, S, D); acc_ref: (S, D) f32 scratch.

    The 1/sqrt(dh) scale is folded into the Q weights at init.  All matmuls
    run in bf16 with f32 accumulation; per-head results land in the f32
    scratch and the output is written back with one lane-dense (S, D) store.
    """
    # TODO(synk): for S >~ 1K, stream K/V with an online-softmax (flash-style)
    # kv grid axis and grid over (B, H) so v7x's second TensorCore gets work
    # even at B == 1.
    qkv = qkv_ref[0]                       # (S, 3D) bf16 -- no f32 upcast
    mask = m_ref[0]                        # (1, S) additive bias, f32
    dh = d_model // n_heads
    for h in range(n_heads):
        q = qkv[:, h * dh:(h + 1) * dh]
        k = qkv[:, d_model + h * dh:d_model + (h + 1) * dh]
        v = qkv[:, 2 * d_model + h * dh:2 * d_model + (h + 1) * dh]
        # q @ k^T, bf16 inputs, f32 accumulation (scale already in q weights)
        s = lax.dot_general(q, k, (((1,), (1,)), ((), ())),
                            preferred_element_type=jnp.float32) + mask
        s = s - jnp.max(s, axis=-1, keepdims=True)
        p = jnp.exp(s)
        p = p * pl.reciprocal(jnp.sum(p, axis=-1, keepdims=True), approx=True)
        acc_ref[:, h * dh:(h + 1) * dh] = jnp.dot(
            p.astype(v.dtype), v, preferred_element_type=jnp.float32)
    o_ref[0] = acc_ref[...].astype(o_ref.dtype)


# ----------------------------------------------------------------------------
# Pallas wrappers
# ----------------------------------------------------------------------------
def pallas_linear(x2d, w, b, activation=None):
    M, K = x2d.shape
    N = w.shape[1]
    tm = _pick_tile(M, (512, 256, 128, 64, 32, 16), 16)
    tn = _pick_tile_n(N)
    tk = _pick_tile(K, (512, 256, 128), 128)
    grid = (M // tm, N // tn, K // tk)
    return pl.pallas_call(
        functools.partial(matmul_kernel, activation=activation),
        out_shape=jax.ShapeDtypeStruct((M, N), x2d.dtype),
        grid=grid,
        in_specs=[
            pl.BlockSpec((tm, tk), lambda i, j, k: (i, k)),
            pl.BlockSpec((tk, tn), lambda i, j, k: (k, j)),
            pl.BlockSpec((1, tn), lambda i, j, k: (0, j)),
        ],
        out_specs=pl.BlockSpec((tm, tn), lambda i, j, k: (i, j)),
        scratch_shapes=[pltpu.VMEM((tm, tn), jnp.float32)],
        compiler_params=pltpu.CompilerParams(
            dimension_semantics=("parallel", "parallel", "arbitrary")),
    )(x2d, w, b.reshape(1, N))


def pallas_linear_add_layernorm(x2d, w, b, res2d, gamma, beta, eps=1e-12):
    """y = LayerNorm(x @ w + b + residual) with the add+LN fused into the
    GEMM epilogue (requires full-N output blocks, i.e. N <= 1024)."""
    M, K = x2d.shape
    N = w.shape[1]
    assert N <= 1024, "fused LN epilogue needs a full-N output tile"
    tm = _pick_tile(M, (512, 256, 128, 64, 32, 16), 16)
    tk = _pick_tile(K, (512, 256, 128), 128)
    grid = (M // tm, K // tk)
    return pl.pallas_call(
        functools.partial(matmul_add_ln_kernel, eps=eps),
        out_shape=jax.ShapeDtypeStruct((M, N), x2d.dtype),
        grid=grid,
        in_specs=[
            pl.BlockSpec((tm, tk), lambda i, k: (i, k)),
            pl.BlockSpec((tk, N), lambda i, k: (k, 0)),
            pl.BlockSpec((1, N), lambda i, k: (0, 0)),
            pl.BlockSpec((tm, N), lambda i, k: (i, 0)),
            pl.BlockSpec((1, N), lambda i, k: (0, 0)),
            pl.BlockSpec((1, N), lambda i, k: (0, 0)),
        ],
        out_specs=pl.BlockSpec((tm, N), lambda i, k: (i, 0)),
        scratch_shapes=[pltpu.VMEM((tm, N), jnp.float32)],
        compiler_params=pltpu.CompilerParams(
            dimension_semantics=("parallel", "arbitrary")),
    )(x2d, w, b.reshape(1, N), res2d, gamma.reshape(1, N), beta.reshape(1, N))


def pallas_layernorm(x2d, gamma, beta, eps=1e-12):
    M, D = x2d.shape
    rm = _pick_tile(M, (1024, 512, 256, 128, 64, 32, 16), 16)
    row = pl.BlockSpec((rm, D), lambda i: (i, 0))
    vec = pl.BlockSpec((1, D), lambda i: (0, 0))
    return pl.pallas_call(
        functools.partial(layernorm_kernel, eps=eps),
        out_shape=jax.ShapeDtypeStruct((M, D), x2d.dtype),
        grid=(M // rm,),
        in_specs=[row, vec, vec],
        out_specs=row,
        compiler_params=pltpu.CompilerParams(dimension_semantics=("parallel",)),
    )(x2d, gamma.reshape(1, D), beta.reshape(1, D))


def pallas_attention(qkv, mask_bias, *, n_heads, d_model, out_dtype):
    B, S, three_d = qkv.shape
    dh = d_model // n_heads
    # rough per-batch VMEM working set: double-buffered qkv + out blocks,
    # f32 (S, D) scratch, (S, S) scores/probs plus per-head temporaries
    est = (2 * S * three_d * qkv.dtype.itemsize
           + 2 * S * d_model * jnp.dtype(out_dtype).itemsize
           + S * d_model * 4
           + 3 * S * S * 4
           + 4 * S * dh * 4)
    vmem_limit = int(min(max(2 * est, 16 * 1024 * 1024), 48 * 1024 * 1024))
    return pl.pallas_call(
        functools.partial(attn_kernel, n_heads=n_heads, d_model=d_model),
        out_shape=jax.ShapeDtypeStruct((B, S, d_model), out_dtype),
        grid=(B,),
        in_specs=[pl.BlockSpec((1, S, three_d), lambda b: (b, 0, 0)),
                  pl.BlockSpec((1, 1, S), lambda b: (b, 0, 0))],
        out_specs=pl.BlockSpec((1, S, d_model), lambda b: (b, 0, 0)),
        scratch_shapes=[pltpu.VMEM((S, d_model), jnp.float32)],
        compiler_params=pltpu.CompilerParams(
            dimension_semantics=("parallel",),
            vmem_limit_bytes=vmem_limit),
    )(qkv, mask_bias)


# ----------------------------------------------------------------------------
# Synthetic BERT model (deterministic init) + forward
# ----------------------------------------------------------------------------
def init_bert_params(key, vocab, max_pos, d_model, n_heads, n_layers, d_ff,
                     dtype=jnp.bfloat16):
    std = 0.02
    dh = d_model // n_heads
    scale = 1.0 / math.sqrt(dh)
    keys = jax.random.split(key, 3 + n_layers)
    p = {
        "word_emb": (std * jax.random.normal(keys[0], (vocab, d_model))).astype(dtype),
        "pos_emb": (std * jax.random.normal(keys[1], (max_pos, d_model))).astype(dtype),
        "type_emb": (std * jax.random.normal(keys[2], (2, d_model))).astype(dtype),
        "emb_ln_g": jnp.ones((d_model,), jnp.float32),
        "emb_ln_b": jnp.zeros((d_model,), jnp.float32),
        "layers": [],
    }
    for li in range(n_layers):
        lk = jax.random.split(keys[3 + li], 6)
        # fold the 1/sqrt(dh) attention scale into the Q projection in f32,
        # BEFORE the bf16 cast (avoids double rounding)
        wq = (std * jax.random.normal(lk[0], (d_model, d_model))) * scale
        wk = std * jax.random.normal(lk[1], (d_model, d_model))
        wv = std * jax.random.normal(lk[2], (d_model, d_model))
        layer = {
            # fused QKV projection: one GEMM instead of three
            "wqkv": jnp.concatenate([wq, wk, wv], axis=1).astype(dtype),
            "bqkv": jnp.zeros((3 * d_model,), dtype),
            "wo": (std * jax.random.normal(lk[3], (d_model, d_model))).astype(dtype),
            "bo": jnp.zeros((d_model,), dtype),
            "attn_ln_g": jnp.ones((d_model,), jnp.float32),
            "attn_ln_b": jnp.zeros((d_model,), jnp.float32),
            "w1": (std * jax.random.normal(lk[4], (d_model, d_ff))).astype(dtype),
            "b1": jnp.zeros((d_ff,), dtype),
            "w2": (std * jax.random.normal(lk[5], (d_ff, d_model))).astype(dtype),
            "b2": jnp.zeros((d_model,), dtype),
            "ffn_ln_g": jnp.ones((d_model,), jnp.float32),
            "ffn_ln_b": jnp.zeros((d_model,), jnp.float32),
        }
        p["layers"].append(layer)
    return p


def bert_forward(params, input_ids, bert_mask, n_heads):
    # Mirrors:  seq_out, pooled_out = self.bert(input_ids, attention_mask=mask)
    #           return seq_out[:, 1:-1, :]
    # (dropout is defined but unused in the reference forward; eval semantics)
    B, S = input_ids.shape
    D = params["word_emb"].shape[1]

    # --- embeddings (gather is glue; LN is a Pallas kernel) ---
    word = jnp.take(params["word_emb"], input_ids, axis=0)           # (B, S, D)
    pos = params["pos_emb"][:S][None, :, :]                          # (1, S, D)
    typ = params["type_emb"][0][None, None, :]                       # type-0 tokens
    x = (word + pos + typ).reshape(B * S, D)
    h = pallas_layernorm(x, params["emb_ln_g"], params["emb_ln_b"])  # (B*S, D)

    # additive attention-mask bias, shared across heads: (B, 1, S) f32 in HBM
    mask_bias = ((1.0 - bert_mask.astype(jnp.float32)) * -10000.0)[:, None, :]

    for layer in params["layers"]:
        # ---- self attention (single fused QKV GEMM, scale folded into Wq) ----
        qkv = pallas_linear(h, layer["wqkv"], layer["bqkv"])          # (B*S, 3D)
        ctx = pallas_attention(qkv.reshape(B, S, 3 * D), mask_bias,
                               n_heads=n_heads, d_model=D,
                               out_dtype=h.dtype)                     # (B, S, D)
        # wo GEMM with residual-add + LayerNorm fused into the epilogue
        h = pallas_linear_add_layernorm(ctx.reshape(B * S, D),
                                        layer["wo"], layer["bo"], h,
                                        layer["attn_ln_g"], layer["attn_ln_b"])
        # ---- feed forward (GELU fused into first GEMM, add+LN into second) ----
        inter = pallas_linear(h, layer["w1"], layer["b1"], activation="gelu")
        h = pallas_linear_add_layernorm(inter, layer["w2"], layer["b2"], h,
                                        layer["ffn_ln_g"], layer["ffn_ln_b"])

    seq_out = h.reshape(B, S, D)
    return seq_out[:, 1:-1, :]          # drop [CLS] and [SEP] positions


# ----------------------------------------------------------------------------
if __name__ == "__main__":
    B, S = 2, 8
    D, H, FF, L = 32, 4, 64, 2
    VOCAB, MAX_POS = 50, 16

    key = jax.random.PRNGKey(0)
    k_params, k_ids = jax.random.split(key)

    params = init_bert_params(k_params, VOCAB, MAX_POS, D, H, L, FF)

    input_ids = jax.random.randint(k_ids, (B, S), 0, VOCAB, dtype=jnp.int32)
    # second example padded: last 3 tokens masked out
    bert_mask = jnp.array([[1] * S, [1] * (S - 3) + [0] * 3], dtype=jnp.float32)

    out = bert_forward(params, input_ids, bert_mask, n_heads=H)
    out = jax.block_until_ready(out)

    assert out.shape == (B, S - 2, D), out.shape
    assert jnp.all(jnp.isfinite(out.astype(jnp.float32)))
    print("KERNEL_OK")
</pallas_src>

<mosaic_0001>
module attributes {stable_mosaic.version = 11 : i64} {
  func.func @layernorm_kernel(%arg0: i32, %arg1: memref<16x32xbf16, #tpu.memory_space<vmem>>, %arg2: memref<1x32xf32, #tpu.memory_space<vmem>>, %arg3: memref<1x32xf32, #tpu.memory_space<vmem>>, %arg4: memref<16x32xbf16, #tpu.memory_space<vmem>>) attributes {dimension_semantics = [#tpu.dimension_semantics<parallel>], iteration_bounds = array<i64: 1>, scalar_prefetch = 0 : i64, scratch_operands = 0 : i64, tpu.core_type = #tpu.core_type<tc>, window_params = [{transform_indices = @transform_0, window_bounds = array<i64: 16, 32>}, {pipeline_mode = #tpu.pipeline_mode<synchronous>, transform_indices = @transform_1, window_bounds = array<i64: 1, 32>}, {pipeline_mode = #tpu.pipeline_mode<synchronous>, transform_indices = @transform_2, window_bounds = array<i64: 1, 32>}, {transform_indices = @transform_3, window_bounds = array<i64: 16, 32>}]} {
    %c0 = arith.constant 0 : index
    %c0_0 = arith.constant 0 : index
    %0 = vector.load %arg1[%c0, %c0_0] : memref<16x32xbf16, #tpu.memory_space<vmem>>, vector<16x32xbf16>
    %1 = arith.extf %0 : vector<16x32xbf16> to vector<16x32xf32>
    %cst = arith.constant dense<0.000000e+00> : vector<16xf32>
    %2 = vector.multi_reduction <add>, %1, %cst [1] : vector<16x32xf32> to vector<16xf32>
    %3 = vector.shape_cast %2 : vector<16xf32> to vector<16x1xf32>
    %cst_1 = arith.constant 3.200000e+01 : f32
    %4 = vector.broadcast %cst_1 : f32 to vector<16x1xf32>
    %5 = arith.divf %3, %4 : vector<16x1xf32>
    %6 = vector.broadcast %5 : vector<16x1xf32> to vector<16x32xf32>
    %7 = arith.subf %1, %6 : vector<16x32xf32>
    %8 = arith.mulf %7, %7 : vector<16x32xf32>
    %cst_2 = arith.constant dense<0.000000e+00> : vector<16xf32>
    %9 = vector.multi_reduction <add>, %8, %cst_2 [1] : vector<16x32xf32> to vector<16xf32>
    %10 = vector.shape_cast %9 : vector<16xf32> to vector<16x1xf32>
    %cst_3 = arith.constant 3.200000e+01 : f32
    %11 = vector.broadcast %cst_3 : f32 to vector<16x1xf32>
    %12 = arith.divf %10, %11 : vector<16x1xf32>
    %cst_4 = arith.constant 9.99999996E-13 : f32
    %13 = vector.broadcast %cst_4 : f32 to vector<16x1xf32>
    %14 = arith.addf %12, %13 : vector<16x1xf32>
    %15 = math.rsqrt %14 : vector<16x1xf32>
    %16 = vector.broadcast %15 : vector<16x1xf32> to vector<16x32xf32>
    %17 = arith.mulf %7, %16 : vector<16x32xf32>
    %c0_5 = arith.constant 0 : index
    %c0_6 = arith.constant 0 : index
    %18 = vector.load %arg2[%c0_5, %c0_6] : memref<1x32xf32, #tpu.memory_space<vmem>>, vector<1x32xf32>
    %19 = vector.broadcast %18 : vector<1x32xf32> to vector<16x32xf32>
    %20 = arith.mulf %17, %19 : vector<16x32xf32>
    %c0_7 = arith.constant 0 : index
    %c0_8 = arith.constant 0 : index
    %21 = vector.load %arg3[%c0_7, %c0_8] : memref<1x32xf32, #tpu.memory_space<vmem>>, vector<1x32xf32>
    %22 = vector.broadcast %21 : vector<1x32xf32> to vector<16x32xf32>
    %23 = arith.addf %20, %22 : vector<16x32xf32>
    %24 = arith.truncf %23 : vector<16x32xf32> to vector<16x32xbf16>
    %c0_9 = arith.constant 0 : index
    %c0_10 = arith.constant 0 : index
    %25 = vector.load %arg4[%c0_9, %c0_10] : memref<16x32xbf16, #tpu.memory_space<vmem>>, vector<16x32xbf16>
    tpu.vector_store %arg4[%c0_9, %c0_10], %24 {strides = array<i32>} : memref<16x32xbf16, #tpu.memory_space<vmem>>, vector<16x32xbf16>,
    return
  }
  func.func @transform_0(%arg0: i32) -> (i32, i32) {
    %c0_i32 = arith.constant 0 : i32
    %c0_i32_0 = arith.constant 0 : i32
    return %arg0, %c0_i32 : i32, i32
  }
  func.func @transform_1(%arg0: i32) -> (i32, i32) {
    %c0_i32 = arith.constant 0 : i32
    %c0_i32_0 = arith.constant 0 : i32
    %c0_i32_1 = arith.constant 0 : i32
    return %c0_i32, %c0_i32_0 : i32, i32
  }
  func.func @transform_2(%arg0: i32) -> (i32, i32) {
    %c0_i32 = arith.constant 0 : i32
    %c0_i32_0 = arith.constant 0 : i32
    %c0_i32_1 = arith.constant 0 : i32
    return %c0_i32, %c0_i32_0 : i32, i32
  }
  func.func @transform_3(%arg0: i32) -> (i32, i32) {
    %c0_i32 = arith.constant 0 : i32
    %c0_i32_0 = arith.constant 0 : i32
    return %arg0, %c0_i32 : i32, i32
  }
}

</mosaic_0001>

<bundles_post_ra>
// kernel: tpu_custom_call.1
= control target key start
LH: loop header
LB: loop body
LE: loop exit
PB: predicated region body
PF: predicated region fallthrough
CT: control target
= control target key end

     0   :  { %8 = vsyncpa [#allocation3], 0  ;;  %s215_s0 = inlined_call_operand.hbm [shape: bf16[16,32], index: 0, kind: input, shape index: {}]   ;;  %s216_s1 = inlined_call_operand.vmem [shape: f32[1,32], index: 1, kind: input, shape index: {}]   ;;  %s217_s2 = inlined_call_operand.vmem [shape: f32[1,32], index: 2, kind: input, shape index: {}]   ;;  %s218_s3 = inlined_call_operand.hbm [shape: bf16[16,32], index: 3, kind: output, shape index: {}]  }
   0x1   :  { %9 = vsyncpa [#allocation4], 0  ;;  %s169_s12 = smov [#allocation2]  }
   0x2   :  { %s15_s13 = sshll.u32 %s169_s12, 4  ;;  %s16_s13 = int_to_ptr.vmem [resolvable:$true] %s15_s13 }
   0x3   :  { %s133_s14 = scalar_lea.vmem %s16_s13, 128  ;;  %p138_p1 = scmp.lt.s32.totalorder %s16_s13, %s16_s13 }
   0x4   :  { %p134_p0 = scmp.ne.s32.totalorder %s16_s13, %s133_s14  ;;  %p139_p2 = scmp.lt.s32.totalorder %s133_s14, %s133_s14 }
   0x6   :  { %p140_p3 = por %p139_p2, %p138_p1 }
   0x8   :  { %p141_p4 = pnand %p140_p3, %p134_p0 }
   0xa   :  { %144 = shalt.err (!%p141_p4)
}
   0xb   :  { %s170_s15 = smov 64   ;;  %s171_s16 = smov 4  }
   0xc   :  { %21 = dma.hbm_to_vmem [thread:$0]  %s215_s0, 128, %s16_s13, [#allocation3], %s170_s15, %s170_s15, %s171_s16  }
   0xd   :  { %165 = dma.done.wait [#allocation3], 128  }
   0xe   :  { %166 = vsyncadd [#allocation3], 4294967168  ;;  %v114_v0 = vld [vmem:[#allocation2] sm:$0xff]   ;;  %vm33_vm0 = vcmask 261120   ;;  %vm87_vm1 = vcmask 257024   ;;  %s172_s22 = smov [#allocation5]  }
   0xf   :  { %v115_v1 = vunpack.c.l.bf16 %v114_v0  ;;  %v116_v2 = vunpack.c.h.bf16 %v114_v0  ;;  %v107_v22 = vld [vmem:[%s216_s1] ss:$0 sm:$0xff]  ;;  %s95_s23 = sshll.u32 %s172_s22, 4  ;;  %s96_s23 = int_to_ptr.vmem [resolvable:$true] %s95_s23 }
  0x10   :  { %v108_v24 = vld [vmem:[%s217_s2] ss:$0 sm:$0xff]  ;;  %s145_s1 = scalar_lea.vmem %s96_s23, 128  ;;  %p150_p6 = scmp.lt.s32.totalorder %s96_s23, %s96_s23 }
  0x11   :  { %v34_v3 = vsel %vm33_vm0, %v115_v1, 0.0  ;;  %v37_v4 = vsel %vm33_vm0, %v116_v2, 0.0  ;;  %p146_p5 = scmp.ne.s32.totalorder %s96_s23, %s145_s1  ;;  %p151_p7 = scmp.lt.s32.totalorder %s145_s1, %s145_s1 }
  0x12   :  { %35 = vadd.xlane.f32.xlu0 %v34_v3 }
  0x13   :  { %p152_p8 = por %p151_p7, %p150_p6 }
  0x15   :  { %p153_p9 = pnand %p152_p8, %p146_p5 }
  0x16   :  { %38 = vadd.xlane.f32.xlu0 %v37_v4 }
  0x9b   :  { %v36_v5 = vpop.xlane.xlu0 %35 }
  0x9c   :  { %v41_v6 = vmul.f32 0.03125, %v36_v5 }
  0x9e   :  { %v43_v7 = vsub.f32 %v115_v1, %v41_v6 }
  0x9f   :  { %v39_v8 = vpop.xlane.xlu0 %38 }
  0xa0   :  { %v42_v9 = vmul.f32 0.03125, %v39_v8  ;;  %v45_v10 = vmul.f32 %v43_v7, %v43_v7 }
  0xa2   :  { %v44_v11 = vsub.f32 %v116_v2, %v42_v9  ;;  %v47_v12 = vsel %vm33_vm0, %v45_v10, 0.0 }
  0xa3   :  { %48 = vadd.xlane.f32.xlu1 %v47_v12 }
  0xa4   :  { %v46_v13 = vmul.f32 %v44_v11, %v44_v11 }
  0xa6   :  { %v50_v14 = vsel %vm33_vm0, %v46_v13, 0.0 }
  0xa7   :  { %51 = vadd.xlane.f32.xlu1 %v50_v14 }
 0x12c   :  { %v49_v15 = vpop.xlane.xlu1 %48 }
 0x12d   :  { %v53_v16 = vmul.f32 0.03125, %v49_v15 }
 0x12f   :  { %v55_v17 = vadd.f32 1e-12, %v53_v16 }
 0x130   :  { %v52_v18 = vpop.xlane.xlu1 %51 }
 0x131   :  { %121 = vrsqrt.f32 %v55_v17  ;;  %v54_v19 = vmul.f32 0.03125, %v52_v18 }
 0x133   :  { %v56_v20 = vadd.f32 1e-12, %v54_v19 }
 0x135   :  { %123 = vrsqrt.f32 %v56_v20 }
 0x13e   :  { %v122_v21 = vpop.eup %121 }
 0x13f   :  { %v59_v23 = vmul.f32 %v122_v21, %v43_v7 }
 0x141   :  { %v68_v25 = vmul.f32 %v107_v22, %v59_v23 }
 0x142   :  { %v124_v26 = vpop.eup %123 }
 0x143   :  { %v60_v27 = vmul.f32 %v124_v26, %v44_v11  ;;  %v77_v28 = vadd.f32 %v108_v24, %v68_v25 }
 0x145   :  { %v69_v29 = vmul.f32 %v107_v22, %v60_v27  ;;  %v111_v30 = vpack.c.bf16 %v77_v28, %v77_v28 }
 0x147   :  { %v78_v31 = vadd.f32 %v108_v24, %v69_v29  ;;  %88 = vst.msk [vmem:[#allocation5] sm:$0xf] %vm87_vm1, %v111_v30 }
 0x149   :  { %v112_v32 = vpack.c.bf16 %v78_v31, %v78_v31 }
 0x14b   :  { %89 = vst.msk [vmem:[#allocation5 + $0x4] sm:$0xf] %vm87_vm1, %v112_v32 }
 0x14c   :  { %156 = shalt.err (!%p153_p9)
}
 0x14d   :  { %101 = dma.vmem_to_hbm [thread:$0]  %s96_s23, 128, %s218_s3, [#allocation4], %s170_s15, %s170_s15, %s171_s16  }
 0x14e   :  { %167 = dma.done.wait [#allocation4], 128  }
 0x14f   :  { %168 = vsyncadd [#allocation4], 4294967168 }
 0x150   :  { %105 = vsyncpa [#allocation3], 1 }
 0x151   :  { %106 = vsyncpa [#allocation4], 1 }

</bundles_post_ra>
